<compile_context>
chip_gen: v7x
topology: tpu7x:2x2x1
jax: 0.10.0
libtpu: 0.0.40
codegen_flags: <defaults>
</compile_context>

<pallas_src>
import jax
import jax.numpy as jnp
from jax.experimental import pallas as pl
from jax.experimental.pallas import tpu as pltpu

_MIB = 1024 * 1024
_PARALLEL = getattr(pltpu, "PARALLEL", "parallel")
_CORE_PARALLEL = getattr(pltpu, "CORE_PARALLEL", None)


# ----------------------------------------------------------------------------
# Kernels
# ----------------------------------------------------------------------------
def _se_kernel(x_ref, w1t_ref, b1_ref, w2t_ref, b2_ref, o_ref):
    """Fused single-pass SE: pool + FC/ReLU/FC/sigmoid + scale on one block."""
    # x_ref: (bt, C, HW) lane-dense block (HW on the 128-lane axis).
    x = x_ref[...]

    # Squeeze: global average pool over the flattened spatial (lane) axis,
    # accumulated in f32 without materializing an f32 copy of the block.
    pooled = jnp.mean(x, axis=-1, dtype=jnp.float32)                  # (bt, C)

    # Excitation: FC -> ReLU -> FC -> sigmoid (weights pre-transposed).
    h = jnp.dot(pooled, w1t_ref[...], preferred_element_type=jnp.float32)
    h = jnp.maximum(h + b1_ref[...], 0.0)                             # (bt, C_red)
    y = jnp.dot(h, w2t_ref[...], preferred_element_type=jnp.float32)
    y = jax.nn.sigmoid(y + b2_ref[...])                               # (bt, C)

    # Scale: broadcast per-channel gate over lanes; multiply in input dtype.
    o_ref[...] = (x * y[..., None].astype(x.dtype)).astype(o_ref.dtype)


def _se_pool_kernel(x_ref, p_ref):
    """Two-pass fallback, pass 1: streamed pool of one (1, c_t, HW) tile."""
    # p_ref block: (1, 1, c_t, 1) -> one mean per channel of this tile.
    p_ref[0] = jnp.mean(x_ref[...], axis=-1, keepdims=True, dtype=jnp.float32)


def _se_gate_kernel(p_ref, w1t_ref, b1_ref, w2t_ref, b2_ref, g_ref):
    """Two-pass fallback: tiny excitation FC on the whole (B, C) pooled array."""
    pooled = p_ref[...]                                               # (B, C) f32
    h = jnp.dot(pooled, w1t_ref[...], preferred_element_type=jnp.float32)
    h = jnp.maximum(h + b1_ref[...], 0.0)
    y = jnp.dot(h, w2t_ref[...], preferred_element_type=jnp.float32)
    g_ref[...] = jax.nn.sigmoid(y + b2_ref[...])


def _se_scale_kernel(x_ref, g_ref, o_ref):
    """Two-pass fallback, pass 2: streamed per-channel scaling."""
    # x_ref/o_ref: (1, c_t, HW); g_ref: (1, 1, c_t, 1) gates for this tile.
    g = g_ref[0].astype(x_ref.dtype)                                  # (1, c_t, 1)
    o_ref[...] = (x_ref[...] * g).astype(o_ref.dtype)


# ----------------------------------------------------------------------------
# Host-side tuning helpers
# ----------------------------------------------------------------------------
def _tpu_generation_params():
    """Returns (vmem_capacity_bytes, num_tensorcores, count_is_explicit)."""
    vmem_cap = 128 * _MIB
    num_tc = 1
    explicit = False
    try:
        info = pltpu.get_tpu_info()
        vmem_cap = int(getattr(info, "vmem_capacity_bytes", vmem_cap))
        for name in ("num_tensorcores", "tensorcore_count", "num_cores",
                     "cores_per_chip", "num_cores_per_chip"):
            v = getattr(info, name, None)
            if isinstance(v, int) and v >= 1:
                num_tc, explicit = int(v), True
                break
        if not explicit and vmem_cap <= 64 * _MIB:
            num_tc = 2  # v7x signature: 64 MiB VMEM per TC, 2 TCs per chip.
    except Exception:
        pass
    return vmem_cap, num_tc, explicit


def _largest_divisor_at_most(n, limit):
    limit = max(1, min(int(n), int(limit)))
    for d in range(limit, 0, -1):
        if n % d == 0:
            return d
    return 1


def _channel_tile(C, HW, itemsize, target_block_bytes, vmem_budget):
    """Largest channel tile (multiple of the sublane pack) that fits VMEM."""
    mult = 8 * max(1, 4 // int(itemsize))        # 8 for f32, 16 for bf16, ...
    cands = [d for d in range(mult, C, mult) if C % d == 0]
    if not cands:
        return None
    fit = [d for d in cands if 6 * d * HW * itemsize + 4 * _MIB <= vmem_budget]
    if not fit:
        return min(cands)                         # best effort
    under = [d for d in fit if d * HW * itemsize <= target_block_bytes]
    return max(under) if under else min(fit)


def _batch_dim_semantics(num_tc, explicit, n_steps):
    """CORE_PARALLEL on explicitly-detected 2-TC chips, else PARALLEL."""
    if (explicit and num_tc >= 2 and _CORE_PARALLEL is not None
            and n_steps >= num_tc and n_steps % num_tc == 0):
        return _CORE_PARALLEL
    return _PARALLEL


# ----------------------------------------------------------------------------
# Wrappers
# ----------------------------------------------------------------------------
def _se_two_pass(x3, w1t, b1_2d, w2t, b2_2d, *, c_t, vmem_budget, batch_sem):
    """Streamed pool -> tiny FC -> streamed scale (for oversized (C,HW) slabs)."""
    B, C, HW = x3.shape
    C_red = w1t.shape[1]
    n_c = C // c_t

    big_params = pltpu.CompilerParams(
        dimension_semantics=(batch_sem, _PARALLEL),
        vmem_limit_bytes=int(vmem_budget),
    )

    # Pass 1: streamed global average pool -> (B, n_c, c_t, 1) means in f32.
    pooled = pl.pallas_call(
        _se_pool_kernel,
        out_shape=jax.ShapeDtypeStruct((B, n_c, c_t, 1), jnp.float32),
        grid_spec=pltpu.PrefetchScalarGridSpec(
            num_scalar_prefetch=0,
            grid=(B, n_c),
            in_specs=[pl.BlockSpec((1, c_t, HW), lambda b, cj: (b, cj, 0))],
            out_specs=pl.BlockSpec((1, 1, c_t, 1), lambda b, cj: (b, cj, 0, 0)),
        ),
        compiler_params=big_params,
    )(x3)

    # Excitation on the tiny (B, C) pooled vector.
    gates = pl.pallas_call(
        _se_gate_kernel,
        out_shape=jax.ShapeDtypeStruct((B, C), jnp.float32),
        grid_spec=pltpu.PrefetchScalarGridSpec(
            num_scalar_prefetch=0,
            grid=(1,),
            in_specs=[
                pl.BlockSpec((B, C), lambda i: (0, 0)),
                pl.BlockSpec((C, C_red), lambda i: (0, 0)),
                pl.BlockSpec((1, C_red), lambda i: (0, 0)),
                pl.BlockSpec((C_red, C), lambda i: (0, 0)),
                pl.BlockSpec((1, C), lambda i: (0, 0)),
            ],
            out_specs=pl.BlockSpec((B, C), lambda i: (0, 0)),
        ),
    )(pooled.reshape(B, C), w1t, b1_2d, w2t, b2_2d)

    # Pass 2: streamed per-channel scaling of x by the gates.
    out3 = pl.pallas_call(
        _se_scale_kernel,
        out_shape=jax.ShapeDtypeStruct((B, C, HW), x3.dtype),
        grid_spec=pltpu.PrefetchScalarGridSpec(
            num_scalar_prefetch=0,
            grid=(B, n_c),
            in_specs=[
                pl.BlockSpec((1, c_t, HW), lambda b, cj: (b, cj, 0)),
                pl.BlockSpec((1, 1, c_t, 1), lambda b, cj: (b, cj, 0, 0)),
            ],
            out_specs=pl.BlockSpec((1, c_t, HW), lambda b, cj: (b, cj, 0)),
        ),
        compiler_params=big_params,
    )(x3, gates.reshape(B, n_c, c_t, 1))

    return out3


def se_layer(x, w1, b1, w2, b2, *, target_block_bytes=None, force_two_pass=False):
    """SELayer forward. x: (B, C, H, W); w1: (C_red, C); w2: (C, C_red)."""
    B, C, H, W = x.shape
    C_red = w1.shape[0]
    HW = H * W

    # Lane-dense layout: flatten H, W so the last (128-lane) dim is H*W.
    x3 = x.reshape(B, C, HW)

    # Pre-transpose weights once on the host (no in-kernel XLU transpose).
    w1t = jnp.asarray(w1).T                        # (C, C_red)
    w2t = jnp.asarray(w2).T                        # (C_red, C)
    b1_2d = jnp.asarray(b1).reshape(1, C_red)
    b2_2d = jnp.asarray(b2).reshape(1, C)

    vmem_cap, num_tc, explicit = _tpu_generation_params()
    # Leave ~1/4 of VMEM as headroom: ~48 MiB on v7x (64 MiB), ~96 MiB on
    # v5e/v6e (128 MiB).
    vmem_budget = min((vmem_cap * 3) // 4, 100 * _MIB)
    if target_block_bytes is None:
        target_block_bytes = 4 * _MIB if vmem_cap <= 64 * _MIB else 8 * _MIB

    itemsize = jnp.dtype(x.dtype).itemsize
    per_elem = C * HW * itemsize
    w_itemsize = jnp.dtype(w1t.dtype).itemsize
    weight_bytes = int(w1t.size + w2t.size + b1_2d.size + b2_2d.size) * w_itemsize

    # Batch tile: largest divisor of B (no pad / slice copies) under the block
    # byte target; on 2-TC chips keep >= num_tc grid steps so both cores' DMA
    # streams are used; 1-TC chips (v5e/v6e) take the single largest block.
    bt = _largest_divisor_at_most(B, target_block_bytes // max(per_elem, 1))
    if num_tc >= 2 and B >= num_tc and (B // bt) < num_tc:
        bt = _largest_divisor_at_most(B, B // num_tc)
    while bt > 1 and 6 * bt * per_elem + 2 * weight_bytes + 2 * _MIB > vmem_budget:
        bt = _largest_divisor_at_most(B, bt - 1)

    single_pass_bytes = 6 * bt * per_elem + 2 * weight_bytes + 2 * _MIB
    if force_two_pass or single_pass_bytes > vmem_budget:
        c_t = _channel_tile(C, HW, itemsize, target_block_bytes, vmem_budget)
        if c_t is not None:
            batch_sem = _batch_dim_semantics(num_tc, explicit, B)
            out3 = _se_two_pass(x3, w1t, b1_2d, w2t, b2_2d, c_t=c_t,
                                vmem_budget=vmem_budget, batch_sem=batch_sem)
            return out3.reshape(B, C, H, W)
        # TODO(synk): no multiple-of-8 channel sub-tile exists for this C; fall
        # through to the fused path at the full VMEM budget.

    nb = B // bt
    block_bytes = bt * per_elem
    vmem_limit = int(min(vmem_budget,
                         max(32 * _MIB,
                             6 * block_bytes + 2 * weight_bytes + 2 * _MIB)))
    batch_sem = _batch_dim_semantics(num_tc, explicit, nb)

    cost = pl.CostEstimate(
        flops=2 * B * C * HW + 4 * B * C * C_red,
        transcendentals=B * C,
        bytes_accessed=2 * B * C * HW * itemsize + 2 * weight_bytes,
    )

    out3 = pl.pallas_call(
        _se_kernel,
        out_shape=jax.ShapeDtypeStruct((B, C, HW), x.dtype),
        grid_spec=pltpu.PrefetchScalarGridSpec(
            num_scalar_prefetch=0,
            grid=(nb,),
            in_specs=[
                pl.BlockSpec((bt, C, HW), lambda i: (i, 0, 0)),
                pl.BlockSpec((C, C_red), lambda i: (0, 0)),
                pl.BlockSpec((1, C_red), lambda i: (0, 0)),
                pl.BlockSpec((C_red, C), lambda i: (0, 0)),
                pl.BlockSpec((1, C), lambda i: (0, 0)),
            ],
            out_specs=pl.BlockSpec((bt, C, HW), lambda i: (i, 0, 0)),
        ),
        compiler_params=pltpu.CompilerParams(
            dimension_semantics=(batch_sem,),
            vmem_limit_bytes=vmem_limit,
        ),
        cost_estimate=cost,
    )(x3, w1t, b1_2d, w2t, b2_2d)

    return out3.reshape(B, C, H, W)


def se_layer_ref(x, w1, b1, w2, b2):
    """Pure-JAX reference mirroring the PyTorch forward."""
    pooled = jnp.mean(x.astype(jnp.float32), axis=(2, 3))
    h = jnp.maximum(pooled @ w1.T + b1, 0.0)
    y = jax.nn.sigmoid(h @ w2.T + b2)
    return (x.astype(jnp.float32) * y[:, :, None, None]).astype(x.dtype)


if __name__ == "__main__":
    B, C, H, W = 2, 32, 16, 16
    reduction = 4                       # channel // reduction = 8
    C_red = C // reduction

    key = jax.random.PRNGKey(0)
    kx, k1, k2, k3, k4 = jax.random.split(key, 5)

    x = jax.random.normal(kx, (B, C, H, W), dtype=jnp.float32)
    # Deterministic synthetic parameters (shapes per nn.Linear in __init__).
    w1 = 0.1 * jax.random.normal(k1, (C_red, C), dtype=jnp.float32)
    b1 = 0.1 * jax.random.normal(k2, (C_red,), dtype=jnp.float32)
    w2 = 0.1 * jax.random.normal(k3, (C, C_red), dtype=jnp.float32)
    b2 = 0.1 * jax.random.normal(k4, (C,), dtype=jnp.float32)

    ref = se_layer_ref(x, w1, b1, w2, b2)

    # 1) Fast path: single fused kernel on lane-dense (B, C, H*W) blocks.
    out = jax.block_until_ready(se_layer(x, w1, b1, w2, b2))
    assert jnp.allclose(out, ref, atol=1e-5, rtol=1e-5), "single-pass mismatch"

    # 2) Two-pass streamed path (used when a (C, H*W) slab would not fit the
    #    per-generation VMEM budget); forced here with a tiny block target so
    #    the channel-tiled pool/scale kernels are exercised and validated.
    out2 = jax.block_until_ready(
        se_layer(x, w1, b1, w2, b2, target_block_bytes=8 * 1024,
                 force_two_pass=True))
    assert jnp.allclose(out2, ref, atol=1e-5, rtol=1e-5), "two-pass mismatch"

    # 3) bf16 activations (weights in f32): gate is rounded to bf16 before the
    #    scale, so a looser tolerance than the f32 path is expected.
    xb = x.astype(jnp.bfloat16)
    outb = jax.block_until_ready(se_layer(xb, w1, b1, w2, b2))
    refb = se_layer_ref(xb, w1, b1, w2, b2).astype(jnp.float32)
    assert jnp.allclose(outb.astype(jnp.float32), refb,
                        atol=3e-2, rtol=3e-2), "bf16 mismatch"

    print("KERNEL_OK")
</pallas_src>

<mosaic_0001>
module attributes {stable_mosaic.version = 11 : i64} {
  func.func @_se_kernel(%arg0: i32, %arg1: memref<2x32x256xf32, #tpu.memory_space<vmem>>, %arg2: memref<32x8xf32, #tpu.memory_space<vmem>>, %arg3: memref<1x8xf32, #tpu.memory_space<vmem>>, %arg4: memref<8x32xf32, #tpu.memory_space<vmem>>, %arg5: memref<1x32xf32, #tpu.memory_space<vmem>>, %arg6: memref<2x32x256xf32, #tpu.memory_space<vmem>>) attributes {dimension_semantics = [#tpu.dimension_semantics<parallel>], iteration_bounds = array<i64: 1>, scalar_prefetch = 0 : i64, scratch_operands = 0 : i64, tpu.core_type = #tpu.core_type<tc>, window_params = [{transform_indices = @transform_0, window_bounds = array<i64: 2, 32, 256>}, {pipeline_mode = #tpu.pipeline_mode<synchronous>, transform_indices = @transform_1, window_bounds = array<i64: 32, 8>}, {pipeline_mode = #tpu.pipeline_mode<synchronous>, transform_indices = @transform_2, window_bounds = array<i64: 1, 8>}, {pipeline_mode = #tpu.pipeline_mode<synchronous>, transform_indices = @transform_3, window_bounds = array<i64: 8, 32>}, {pipeline_mode = #tpu.pipeline_mode<synchronous>, transform_indices = @transform_4, window_bounds = array<i64: 1, 32>}, {transform_indices = @transform_5, window_bounds = array<i64: 2, 32, 256>}]} {
    %c0 = arith.constant 0 : index
    %c0_0 = arith.constant 0 : index
    %c0_1 = arith.constant 0 : index
    %0 = vector.load %arg1[%c0, %c0_0, %c0_1] : memref<2x32x256xf32, #tpu.memory_space<vmem>>, vector<2x32x256xf32>
    %cst = arith.constant dense<0.000000e+00> : vector<2x32xf32>
    %1 = vector.multi_reduction <add>, %0, %cst [2] : vector<2x32x256xf32> to vector<2x32xf32>
    %cst_2 = arith.constant 2.560000e+02 : f32
    %2 = vector.broadcast %cst_2 : f32 to vector<2x32xf32>
    %3 = arith.divf %1, %2 : vector<2x32xf32>
    %c0_3 = arith.constant 0 : index
    %c0_4 = arith.constant 0 : index
    %4 = vector.load %arg2[%c0_3, %c0_4] : memref<32x8xf32, #tpu.memory_space<vmem>>, vector<32x8xf32>
    %cst_5 = arith.constant dense<0.000000e+00> : vector<2x8xf32>
    %5 = tpu.matmul %3, %4, %cst_5 {dimension_numbers = #tpu.dot_dimension_numbers<[1], [0], [0], [1], [0, 0, 1, 1], [], []>} : vector<2x32xf32>, vector<32x8xf32>, vector<2x8xf32> -> vector<2x8xf32>
    %c0_6 = arith.constant 0 : index
    %c0_7 = arith.constant 0 : index
    %6 = vector.load %arg3[%c0_6, %c0_7] : memref<1x8xf32, #tpu.memory_space<vmem>>, vector<1x8xf32>
    %7 = vector.broadcast %6 : vector<1x8xf32> to vector<2x8xf32>
    %8 = arith.addf %5, %7 : vector<2x8xf32>
    %cst_8 = arith.constant 0.000000e+00 : f32
    %9 = vector.broadcast %cst_8 : f32 to vector<2x8xf32>
    %10 = arith.maximumf %8, %9 : vector<2x8xf32>
    %c0_9 = arith.constant 0 : index
    %c0_10 = arith.constant 0 : index
    %11 = vector.load %arg4[%c0_9, %c0_10] : memref<8x32xf32, #tpu.memory_space<vmem>>, vector<8x32xf32>
    %cst_11 = arith.constant dense<0.000000e+00> : vector<2x32xf32>
    %12 = tpu.matmul %10, %11, %cst_11 {dimension_numbers = #tpu.dot_dimension_numbers<[1], [0], [0], [1], [0, 0, 1, 1], [], []>} : vector<2x8xf32>, vector<8x32xf32>, vector<2x32xf32> -> vector<2x32xf32>
    %c0_12 = arith.constant 0 : index
    %c0_13 = arith.constant 0 : index
    %13 = vector.load %arg5[%c0_12, %c0_13] : memref<1x32xf32, #tpu.memory_space<vmem>>, vector<1x32xf32>
    %14 = vector.broadcast %13 : vector<1x32xf32> to vector<2x32xf32>
    %15 = arith.addf %12, %14 : vector<2x32xf32>
    %16 = arith.negf %15 : vector<2x32xf32>
    %17 = math.exp %16 : vector<2x32xf32>
    %cst_14 = arith.constant 1.000000e+00 : f32
    %18 = vector.broadcast %cst_14 : f32 to vector<2x32xf32>
    %19 = arith.addf %18, %17 : vector<2x32xf32>
    %20 = arith.divf %18, %19 : vector<2x32xf32>
    %21 = vector.shape_cast %20 : vector<2x32xf32> to vector<2x32x1xf32>
    %22 = vector.broadcast %21 : vector<2x32x1xf32> to vector<2x32x256xf32>
    %23 = arith.mulf %0, %22 : vector<2x32x256xf32>
    %c0_15 = arith.constant 0 : index
    %c0_16 = arith.constant 0 : index
    %c0_17 = arith.constant 0 : index
    %24 = vector.load %arg6[%c0_15, %c0_16, %c0_17] : memref<2x32x256xf32, #tpu.memory_space<vmem>>, vector<2x32x256xf32>
    tpu.vector_store %arg6[%c0_15, %c0_16, %c0_17], %23 {strides = array<i32>} : memref<2x32x256xf32, #tpu.memory_space<vmem>>, vector<2x32x256xf32>,
    return
  }
  func.func @transform_0(%arg0: i32) -> (i32, i32, i32) {
    %c0_i32 = arith.constant 0 : i32
    %c0_i32_0 = arith.constant 0 : i32
    %c0_i32_1 = arith.constant 0 : i32
    return %arg0, %c0_i32, %c0_i32_0 : i32, i32, i32
  }
  func.func @transform_1(%arg0: i32) -> (i32, i32) {
    %c0_i32 = arith.constant 0 : i32
    %c0_i32_0 = arith.constant 0 : i32
    %c0_i32_1 = arith.constant 0 : i32
    return %c0_i32, %c0_i32_0 : i32, i32
  }
  func.func @transform_2(%arg0: i32) -> (i32, i32) {
    %c0_i32 = arith.constant 0 : i32
    %c0_i32_0 = arith.constant 0 : i32
    %c0_i32_1 = arith.constant 0 : i32
    return %c0_i32, %c0_i32_0 : i32, i32
  }
  func.func @transform_3(%arg0: i32) -> (i32, i32) {
    %c0_i32 = arith.constant 0 : i32
    %c0_i32_0 = arith.constant 0 : i32
    %c0_i32_1 = arith.constant 0 : i32
    return %c0_i32, %c0_i32_0 : i32, i32
  }
  func.func @transform_4(%arg0: i32) -> (i32, i32) {
    %c0_i32 = arith.constant 0 : i32
    %c0_i32_0 = arith.constant 0 : i32
    %c0_i32_1 = arith.constant 0 : i32
    return %c0_i32, %c0_i32_0 : i32, i32
  }
  func.func @transform_5(%arg0: i32) -> (i32, i32, i32) {
    %c0_i32 = arith.constant 0 : i32
    %c0_i32_0 = arith.constant 0 : i32
    %c0_i32_1 = arith.constant 0 : i32
    return %arg0, %c0_i32, %c0_i32_0 : i32, i32, i32
  }
}

</mosaic_0001>

<bundles_post_ra>
// kernel: tpu_custom_call.1
= control target key start
LH: loop header
LB: loop body
LE: loop exit
PB: predicated region body
PF: predicated region fallthrough
CT: control target
= control target key end

     0   :  { %10 = vsyncpa [#allocation3], 0  ;;  %s653_s0 = inlined_call_operand.hbm [shape: f32[2,32,256], index: 0, kind: input, shape index: {}]   ;;  %s654_s1 = inlined_call_operand.vmem [shape: f32[32,8], index: 1, kind: input, shape index: {}]   ;;  %s655_s2 = inlined_call_operand.vmem [shape: f32[1,8], index: 2, kind: input, shape index: {}]   ;;  %s656_s3 = inlined_call_operand.vmem [shape: f32[8,32], index: 3, kind: input, shape index: {}]   ;;  %s657_s4 = inlined_call_operand.vmem [shape: f32[1,32], index: 4, kind: input, shape index: {}]   ;;  %s658_s5 = inlined_call_operand.hbm [shape: f32[2,32,256], index: 5, kind: output, shape index: {}]  }
   0x1   :  { %11 = vsyncpa [#allocation4], 0  ;;  %s493_s18 = smov [#allocation2]   ;;  %s445_s22 = scalar_lea.hbm %s653_s0, 2048 }
   0x2   :  { %s17_s19 = sshll.u32 %s493_s18, 4  ;;  %p446_p0 = scmp.ne.s32.totalorder %s653_s0, %s445_s22  ;;  %s18_s19 = int_to_ptr.vmem [resolvable:$true] %s17_s19 }
   0x3   :  { %p449_p1 = scmp.lt.u32.totalorder %s445_s22, %s653_s0 }
   0x5   :  { %p451_p2 = pnand %p449_p1, %p446_p0 }
   0x7   :  { %454 = shalt.err (!%p451_p2)
}
   0x8   :  { %s455_s27 = scalar_lea.vmem %s18_s19, 2048  ;;  %p460_p4 = scmp.lt.s32.totalorder %s18_s19, %s18_s19 }
   0x9   :  { %p456_p3 = scmp.ne.s32.totalorder %s18_s19, %s455_s27  ;;  %p461_p5 = scmp.lt.s32.totalorder %s455_s27, %s455_s27 }
   0xb   :  { %p462_p6 = por %p461_p5, %p460_p4 }
   0xd   :  { %p463_p7 = pnand %p462_p6, %p456_p3 }
   0xf   :  { %466 = shalt.err (!%p463_p7)
}
  0x10   :  { %s494_s28 = smov 256   ;;  %s495_s29 = smov 16  }
  0x11   :  { %23 = dma.hbm_to_vmem [thread:$0]  %s653_s0, 2048, %s18_s19, [#allocation3], %s494_s28, %s494_s28, %s495_s29  }
  0x12   :  { %489 = dma.done.wait [#allocation3], 2048  }
  0x13   :  { %490 = vsyncadd [#allocation3], 4294965248  ;;  %v545_v0 = vld [vmem:[#allocation2 + $0x40] sm:$0xff]  ;;  %v547_v1 = vld [vmem:[#allocation2 + $0x48] sm:$0xff]  ;;  %v496_v27 = vmov 0.0|0.0   ;;  %vm497_vm0 = vmmov 0   ;;  %v103_v32 = vlaneseq }
  0x14   :  { %v549_v2 = vld [vmem:[#allocation2] sm:$0xff]  ;;  %v63_v3 = vadd.f32 %v547_v1, %v545_v0  ;;  %v553_v4 = vld [vmem:[#allocation2 + $0x8] sm:$0xff]  ;;  %v555_v5 = vld [vmem:[#allocation2 + $0x50] sm:$0xff]  ;;  %428 = vmatprep.subr.bf16.mxu0 %v496_v27  ;;  %v498_v31 = vmov 0.0   ;;  %vm114_vm1 = vcmask 130112   ;;  %vm121_vm2 = vcmask 195712  }
  0x15   :  { %v557_v6 = vld [vmem:[#allocation2 + $0x58] sm:$0xff]  ;;  %v51_v7 = vadd.f32 %v553_v4, %v549_v2  ;;  %v561_v8 = vld [vmem:[#allocation2 + $0x10] sm:$0xff]  ;;  %v569_v12 = vld [vmem:[#allocation2 + $0x60] sm:$0xff]  ;;  %420 = vmatprep.mubr.msk.f32.mxu0 %vm497_vm0, %v498_v31  ;;  %423 = vmatprep.subr.mxu1 %v498_v31  ;;  %v104_v34 = vand.u32 127, %v103_v32  ;;  %v605_v39 = vshrl.u32 %v103_v32, 7  ;;  %vm128_vm3 = vcmask 261312  }
  0x16   :  { %v563_v9 = vld [vmem:[#allocation2 + $0x18] sm:$0xff]  ;;  %64 = vadd.xlane.f32.xlu1 %v63_v3  ;;  %v66_v10 = vadd.f32 %v557_v6, %v555_v5  ;;  %v571_v13 = vld [vmem:[#allocation2 + $0x68] sm:$0xff]  ;;  %v573_v14 = vld [vmem:[#allocation2 + $0x20] sm:$0xff]  ;;  %425 = vmatprep.mubr.msk.f32.mxu1 %vm497_vm0, %v498_v31  ;;  %vm149_vm4 = vcmask 1041409   ;;  %vm151_vm5 = vcmask 261120   ;;  %vm233_vm6 = vcmask 64512  }
  0x17   :  { %52 = vadd.xlane.f32.xlu0 %v51_v7  ;;  %v54_v11 = vadd.f32 %v563_v9, %v561_v8  ;;  %v575_v15 = vld [vmem:[#allocation2 + $0x28] sm:$0xff]  ;;  %v69_v16 = vadd.f32 %v571_v13, %v569_v12  ;;  %v581_v18 = vld [vmem:[#allocation2 + $0x70] sm:$0xff]  ;;  %v583_v19 = vld [vmem:[#allocation2 + $0x78] sm:$0xff]  ;;  %v109_v36 = vadd.s32 4294967288, %v104_v34  ;;  %v116_v38 = vadd.s32 4294967280, %v104_v34 }
  0x18   :  { %v57_v17 = vadd.f32 %v575_v15, %v573_v14  ;;  %v585_v20 = vld [vmem:[#allocation2 + $0x30] sm:$0xff]  ;;  %v587_v21 = vld [vmem:[#allocation2 + $0x38] sm:$0xff]  ;;  %v72_v22 = vadd.f32 %v583_v19, %v581_v18  ;;  %v84_v24 = vld [vmem:[%s654_s1] sm:$0xff]  ;;  %v123_v43 = vadd.s32 4294967272, %v104_v34  ;;  %v107_v47 = vsub.s32 %v104_v34, %v605_v39 }
  0x19   :  { %v60_v23 = vadd.f32 %v587_v21, %v585_v20  ;;  %v85_v25 = vld [vmem:[%s654_s1 + $0x8] sm:$0xff]  ;;  %v86_v28 = vld [vmem:[%s654_s1 + $0x10] sm:$0xff]  ;;  %v87_v29 = vld [vmem:[%s654_s1 + $0x18] sm:$0xff]  ;;  %v112_v41 = vsub.s32 %v109_v36, %v605_v39  ;;  %v119_v45 = vsub.s32 %v116_v38, %v605_v39  ;;  %v315_v38 = vsub.s32 0, %v605_v39 }
  0x1a   :  { %67 = vadd.xlane.f32.xlu1 %v66_v10  ;;  %v429_v26 = vpack.c.bf16 %v85_v25, %v84_v24  ;;  %v432_v30 = vpack.c.bf16 %v87_v29, %v86_v28  ;;  %v126_v54 = vsub.s32 %v123_v43, %v605_v39  ;;  %v225_v25 = vld [vmem:[%s656_s3] sm:$0xff] }
  0x1b   :  { %55 = vadd.xlane.f32.xlu0 %v54_v11  ;;  %424 = vmatpush3.msra.mxu1 %v225_v25  ;;  %v402_v31 = vld [vmem:[%s657_s4] ss:$0 sm:$0xff] }
  0x1c   :  { %430 = vmatpush3.bf16.msra.mxu0 %v429_v26  ;;  %v400_v26 = vld [vmem:[%s655_s2] ss:$0 sm:$0xff]  ;;  %s499_s2 = smov [#allocation5]  }
  0x1d   :  { %431 = vmatprep.subr.bf16.mxu0 %v496_v27  ;;  %s388_s3 = sshll.u32 %s499_s2, 4  ;;  %s389_s3 = int_to_ptr.vmem [resolvable:$true] %s388_s3 }
  0x1e   :  { %70 = vadd.xlane.f32.xlu1 %v69_v16  ;;  %s467_s4 = scalar_lea.vmem %s389_s3, 2048  ;;  %p472_p9 = scmp.lt.s32.totalorder %s389_s3, %s389_s3 }
  0x1f   :  { %58 = vadd.xlane.f32.xlu0 %v57_v17  ;;  %p468_p8 = scmp.ne.s32.totalorder %s389_s3, %s467_s4  ;;  %p473_p10 = scmp.lt.s32.totalorder %s467_s4, %s467_s4 }
  0x20   :  { %433 = vmatpush3.bf16.msra.mxu0 %v432_v30 }
  0x21   :  { %p474_p11 = por %p473_p10, %p472_p9 }
  0x22   :  { %73 = vadd.xlane.f32.xlu1 %v72_v22 }
  0x23   :  { %61 = vadd.xlane.f32.xlu0 %v60_v23  ;;  %p475_p12 = pnand %p474_p11, %p468_p8 }
  0xa3   :  { %v65_v33 = vpop.xlane.xlu1 %64 }
  0xa4   :  { %v53_v35 = vpop.xlane.xlu0 %52  ;;  %v80_v48 = vmul.f32 0.00390625, %v65_v33 }
  0xa5   :  { %v76_v51 = vmul.f32 0.00390625, %v53_v35 }
  0xa6   :  { %v133_v58 = vrot.slane %v80_v48, %v107_v47 }
  0xa7   :  { %v68_v37 = vpop.xlane.xlu1 %67  ;;  %v108_v62 = vrot.slane %v76_v51, %v107_v47 }
  0xa8   :  { %v56_v40 = vpop.xlane.xlu0 %55  ;;  %v81_v42 = vmul.f32 0.00390625, %v68_v37 }
  0xa9   :  { %v77_v44 = vmul.f32 0.00390625, %v56_v40 }
  0xaa   :  { %v137_v53 = vrot.slane %v81_v42, %v112_v41  ;;  %v334_v42 = vsub.s32 1, %v605_v39 }
  0xab   :  { %v71_v46 = vpop.xlane.xlu1 %70  ;;  %v113_v55 = vrot.slane %v77_v44, %v112_v41 }
  0xac   :  { %v82_v49 = vmul.f32 0.00390625, %v71_v46  ;;  %v59_v50 = vpop.xlane.xlu0 %58  ;;  %v138_v3 = vsel %vm114_vm1, %v137_v53, %v133_v58 }
  0xad   :  { %v78_v52 = vmul.f32 0.00390625, %v59_v50  ;;  %v115_v10 = vsel %vm114_vm1, %v113_v55, %v108_v62 }
  0xae   :  { %v142_v56 = vrot.slane %v82_v49, %v119_v45 }
  0xaf   :  { %v74_v57 = vpop.xlane.xlu1 %73  ;;  %v120_v59 = vrot.slane %v78_v52, %v119_v45 }
  0xb0   :  { %v83_v60 = vmul.f32 0.00390625, %v74_v57  ;;  %v62_v61 = vpop.xlane.xlu0 %61  ;;  %v143_v11 = vsel %vm121_vm2, %v142_v56, %v138_v3 }
  0xb1   :  { %v79_v63 = vmul.f32 0.00390625, %v62_v61  ;;  %v122_v17 = vsel %vm121_vm2, %v120_v59, %v115_v10 }
  0xb2   :  { %v147_v7 = vrot.slane %v83_v60, %v126_v54 }
  0xb3   :  { %v127_v16 = vrot.slane %v79_v63, %v126_v54 }
  0xb4   :  { %v148_v22 = vsel %vm128_vm3, %v147_v7, %v143_v11 }
  0xb5   :  { %v129_v23 = vsel %vm128_vm3, %v127_v16, %v122_v17 }
  0xb6   :  { %v150_v24 = vsel %vm149_vm4, %v148_v22, %v129_v23 }
  0xb7   :  { %421 = vmatmul.mubr.msk.f32.vlgmr.msra.gmra.mrb[0].mxu0 %vm151_vm5, %v150_v24 }
 0x18a   :  { %v220_v27 = vpop.f32.mrb[0].mxu0 }
 0x18b   :  { %v221_v28 = vadd.f32 %v400_v26, %v220_v27  ;;  %v422_v29 = vpop.f32.mrb[1].mxu0 }
 0x18d   :  { %v224_v30 = vmax.f32 %v221_v28, 0.0 }
 0x18f   :  { %426 = vmatmul.mubr.msk.f32.vlgmr.msra.gmra.mrb[0].mxu1 %vm233_vm6, %v224_v30 }
 0x262   :  { %v303_v32 = vpop.f32.mrb[0].mxu1 }
 0x263   :  { %v304_v33 = vadd.f32 %v402_v31, %v303_v32  ;;  %v427_v34 = vpop.f32.mrb[1].mxu1 }
 0x265   :  { %v404_v35 = vmul.f32 -1.442695, %v304_v33 }
 0x267   :  { %441 = vpow2.f32 %v404_v35 }
 0x271   :  { %v442_v36 = vpop.eup %441 }
 0x272   :  { %v310_v37 = vadd.f32 1.0, %v442_v36 }
 0x274   :  { %443 = vrcp.f32 %v310_v37 }
 0x27e   :  { %v444_v40 = vpop.eup %443 }
 0x27f   :  { %v316_v41 = vrot.slane %v444_v40, %v315_v38  ;;  %v335_v43 = vrot.slane %v444_v40, %v334_v42 }
 0x281   :  { %322 = vbcast.lane.b32.xlu1 %v316_v41, 264  ;;  %318 = vbcast.lane.b32.xlu0 %v316_v41, 256 }
 0x285   :  { %326 = vbcast.lane.b32.xlu1 %v316_v41, 272  ;;  %337 = vbcast.lane.b32.xlu0 %v335_v43, 256 }
 0x289   :  { %330 = vbcast.lane.b32.xlu1 %v316_v41, 280  ;;  %345 = vbcast.lane.b32.xlu0 %v335_v43, 272 }
 0x28d   :  { %341 = vbcast.lane.b32.xlu1 %v335_v43, 264 }
 0x291   :  { %349 = vbcast.lane.b32.xlu1 %v335_v43, 280 }
 0x2f3   :  { %v323_v44 = vpop.permute.xlu1 %322  ;;  %v319_v45 = vpop.permute.xlu0 %318 }
 0x2f4   :  { %v353_v46 = vmul.f32 %v323_v44, %v561_v8  ;;  %v354_v47 = vmul.f32 %v323_v44, %v563_v9  ;;  %v351_v48 = vmul.f32 %v319_v45, %v549_v2  ;;  %v352_v49 = vmul.f32 %v319_v45, %v553_v4 }
 0x2f6   :  { %369 = vst [vmem:[#allocation5 + $0x10] sm:$0xff] %v353_v46  ;;  %370 = vst [vmem:[#allocation5 + $0x18] sm:$0xff] %v354_v47 }
 0x2f7   :  { %367 = vst [vmem:[#allocation5] sm:$0xff] %v351_v48  ;;  %368 = vst [vmem:[#allocation5 + $0x8] sm:$0xff] %v352_v49  ;;  %v327_v39 = vpop.permute.xlu1 %326  ;;  %v338_v50 = vpop.permute.xlu0 %337 }
 0x2f8   :  { %v355_v51 = vmul.f32 %v327_v39, %v573_v14  ;;  %v356_v52 = vmul.f32 %v327_v39, %v575_v15  ;;  %v359_v53 = vmul.f32 %v338_v50, %v545_v0  ;;  %v360_v8 = vmul.f32 %v338_v50, %v547_v1 }
 0x2fa   :  { %371 = vst [vmem:[#allocation5 + $0x20] sm:$0xff] %v355_v51  ;;  %372 = vst [vmem:[#allocation5 + $0x28] sm:$0xff] %v356_v52 }
 0x2fb   :  { %375 = vst [vmem:[#allocation5 + $0x40] sm:$0xff] %v359_v53  ;;  %376 = vst [vmem:[#allocation5 + $0x48] sm:$0xff] %v360_v8  ;;  %v331_v2 = vpop.permute.xlu1 %330  ;;  %v346_v4 = vpop.permute.xlu0 %345 }
 0x2fc   :  { %v357_v9 = vmul.f32 %v331_v2, %v585_v20  ;;  %v358_v54 = vmul.f32 %v331_v2, %v587_v21  ;;  %v363_v55 = vmul.f32 %v346_v4, %v569_v12  ;;  %v364_v14 = vmul.f32 %v346_v4, %v571_v13 }
 0x2fe   :  { %373 = vst [vmem:[#allocation5 + $0x30] sm:$0xff] %v357_v9  ;;  %374 = vst [vmem:[#allocation5 + $0x38] sm:$0xff] %v358_v54 }
 0x2ff   :  { %379 = vst [vmem:[#allocation5 + $0x60] sm:$0xff] %v363_v55  ;;  %380 = vst [vmem:[#allocation5 + $0x68] sm:$0xff] %v364_v14  ;;  %v342_v0 = vpop.permute.xlu1 %341 }
 0x300   :  { %v361_v1 = vmul.f32 %v342_v0, %v555_v5  ;;  %v362_v15 = vmul.f32 %v342_v0, %v557_v6 }
 0x302   :  { %377 = vst [vmem:[#allocation5 + $0x50] sm:$0xff] %v361_v1  ;;  %378 = vst [vmem:[#allocation5 + $0x58] sm:$0xff] %v362_v15 }
 0x303   :  { %v350_v20 = vpop.permute.xlu1 %349 }
 0x304   :  { %v365_v21 = vmul.f32 %v350_v20, %v581_v18  ;;  %v366_v12 = vmul.f32 %v350_v20, %v583_v19 }
 0x306   :  { %381 = vst [vmem:[#allocation5 + $0x70] sm:$0xff] %v365_v21  ;;  %382 = vst [vmem:[#allocation5 + $0x78] sm:$0xff] %v366_v12 }
 0x307   :  { %478 = shalt.err (!%p475_p12)
}
 0x308   :  { %s479_s21 = scalar_lea.hbm %s658_s5, 2048 }
 0x309   :  { %p480_p13 = scmp.ne.s32.totalorder %s658_s5, %s479_s21  ;;  %p483_p0 = scmp.lt.u32.totalorder %s479_s21, %s658_s5 }
 0x30b   :  { %p485_p1 = pnand %p483_p0, %p480_p13 }
 0x30d   :  { %488 = shalt.err (!%p485_p1)
}
 0x30e   :  { %394 = dma.vmem_to_hbm [thread:$0]  %s389_s3, 2048, %s658_s5, [#allocation4], %s494_s28, %s494_s28, %s495_s29  }
 0x30f   :  { %491 = dma.done.wait [#allocation4], 2048  }
 0x310   :  { %492 = vsyncadd [#allocation4], 4294965248 }
 0x311   :  { %398 = vsyncpa [#allocation3], 1 }
 0x312   :  { %399 = vsyncpa [#allocation4], 1 }

</bundles_post_ra>
